<compile_context>
chip_gen: v7x
topology: tpu7x:2x2x1
jax: 0.10.0
libtpu: 0.0.40
codegen_flags: <defaults>
</compile_context>

<pallas_src>
import jax
import jax.numpy as jnp
from jax.experimental import pallas as pl
from jax.experimental.pallas import tpu as pltpu

_MAX_TILE_BYTES = 2 * 1024 * 1024  # ~2 MiB f32 per tile; 4x that with in+out double buffering.


def _normalize_kernel(scale_ref, bias_ref, x_ref, o_ref):
    # scale_ref / bias_ref: (C, 1) float32 in VMEM (broadcast along the lane dim).
    # x_ref / o_ref: (bn, C, T) tile of the flattened (N, C, H*W) tensor.
    scale = scale_ref[...][None, :, :]            # (1, C, 1)
    bias = bias_ref[...][None, :, :]              # (1, C, 1)
    x = x_ref[...].astype(jnp.float32)
    o_ref[...] = (x * scale + bias).astype(o_ref.dtype)


def _largest_divisor(n, cap, multiple_of=1):
    """Largest divisor of n that is <= cap and a multiple of `multiple_of` (or None)."""
    best = None
    for d in range(1, n + 1):
        if d > cap:
            break
        if n % d == 0 and d % multiple_of == 0:
            best = d
    return best


def _choose_hw_tile(hw, c, max_tile_bytes):
    """Pick a lane-dense tile along the flattened spatial axis."""
    max_elems = max(1, max_tile_bytes // (4 * c))
    if hw <= max_elems:
        return hw
    t = _largest_divisor(hw, cap=max_elems, multiple_of=128)
    # If we can't tile the lane dim in multiples of 128, take the full extent
    # (block == full array dim is always layout-legal).
    return t if t is not None else hw


def normalize(x, mean, std):
    """x: (N, C, H, W); mean/std: (C,). Returns (x - mean[c]) / std[c] per channel."""
    N, C, H, W = x.shape
    HW = H * W

    mean = jnp.asarray(mean, dtype=jnp.float32)
    std = jnp.asarray(std, dtype=jnp.float32)
    scale = (1.0 / std).reshape(C, 1)            # keep params in f32 (SMEM/VMEM scalars are 32-bit)
    bias = (-mean / std).reshape(C, 1)

    x_flat = x.reshape(N, C, HW)                 # free reshape for contiguous NCHW

    hw_tile = _choose_hw_tile(HW, C, _MAX_TILE_BYTES)
    bn_cap = max(1, _MAX_TILE_BYTES // (4 * C * hw_tile))
    bn = _largest_divisor(N, cap=min(N, bn_cap), multiple_of=1) or 1

    # Prefer at least 2 grid steps so megacore (v7x) can shard across TensorCores.
    if (N // bn) * (HW // hw_tile) < 2:
        if N >= 2:
            bn = _largest_divisor(N, cap=max(1, N // 2), multiple_of=1) or 1
        elif hw_tile % 256 == 0:
            hw_tile //= 2

    grid = (N // bn, HW // hw_tile)

    out_flat = pl.pallas_call(
        _normalize_kernel,
        out_shape=jax.ShapeDtypeStruct((N, C, HW), x.dtype),
        grid=grid,
        in_specs=[
            pl.BlockSpec((C, 1), lambda i, j: (0, 0)),                 # scale (full, VMEM)
            pl.BlockSpec((C, 1), lambda i, j: (0, 0)),                 # bias  (full, VMEM)
            pl.BlockSpec((bn, C, hw_tile), lambda i, j: (i, 0, j)),    # x tile
        ],
        out_specs=pl.BlockSpec((bn, C, hw_tile), lambda i, j: (i, 0, j)),
        compiler_params=pltpu.CompilerParams(
            dimension_semantics=("parallel", "parallel")
        ),
    )(scale, bias, x_flat)

    return out_flat.reshape(N, C, H, W)


if __name__ == "__main__":
    key = jax.random.PRNGKey(0)
    N, C, H, W = 2, 4, 16, 16
    x = jax.random.uniform(key, (N, C, H, W), dtype=jnp.float32)

    # Deterministic per-channel parameters (module __init__ takes mean, std lists).
    mean = jnp.array([0.1, 0.2, 0.3, 0.4], dtype=jnp.float32)
    std = jnp.array([0.5, 0.6, 0.7, 0.8], dtype=jnp.float32)

    out = normalize(x, mean, std)
    jax.block_until_ready(out)

    # Reference (mirrors the PyTorch per-channel loop semantics).
    ref = (x - mean[None, :, None, None]) / std[None, :, None, None]
    assert out.shape == x.shape and out.dtype == x.dtype
    # scale/bias rewrite differs from a true divide by ~1 ulp.
    assert jnp.allclose(out, ref, atol=1e-5, rtol=1e-5), "mismatch vs reference"

    print("KERNEL_OK")
</pallas_src>

<mosaic_0001>
module attributes {stable_mosaic.version = 11 : i64} {
  func.func @_normalize_kernel(%arg0: i32, %arg1: i32, %arg2: memref<4x1xf32, #tpu.memory_space<vmem>>, %arg3: memref<4x1xf32, #tpu.memory_space<vmem>>, %arg4: memref<1x4x256xf32, #tpu.memory_space<vmem>>, %arg5: memref<1x4x256xf32, #tpu.memory_space<vmem>>) attributes {dimension_semantics = [#tpu.dimension_semantics<parallel>, #tpu.dimension_semantics<parallel>], iteration_bounds = array<i64: 2, 1>, scalar_prefetch = 0 : i64, scratch_operands = 0 : i64, tpu.core_type = #tpu.core_type<tc>, window_params = [{pipeline_mode = #tpu.pipeline_mode<synchronous>, transform_indices = @transform_0, window_bounds = array<i64: 4, 1>}, {pipeline_mode = #tpu.pipeline_mode<synchronous>, transform_indices = @transform_1, window_bounds = array<i64: 4, 1>}, {transform_indices = @transform_2, window_bounds = array<i64: 1, 4, 256>}, {transform_indices = @transform_3, window_bounds = array<i64: 1, 4, 256>}]} {
    %c0 = arith.constant 0 : index
    %c0_0 = arith.constant 0 : index
    %0 = vector.load %arg2[%c0, %c0_0] : memref<4x1xf32, #tpu.memory_space<vmem>>, vector<4x1xf32>
    %1 = vector.shape_cast %0 : vector<4x1xf32> to vector<1x4x1xf32>
    %c0_1 = arith.constant 0 : index
    %c0_2 = arith.constant 0 : index
    %2 = vector.load %arg3[%c0_1, %c0_2] : memref<4x1xf32, #tpu.memory_space<vmem>>, vector<4x1xf32>
    %3 = vector.shape_cast %2 : vector<4x1xf32> to vector<1x4x1xf32>
    %c0_3 = arith.constant 0 : index
    %c0_4 = arith.constant 0 : index
    %c0_5 = arith.constant 0 : index
    %4 = vector.load %arg4[%c0_3, %c0_4, %c0_5] : memref<1x4x256xf32, #tpu.memory_space<vmem>>, vector<1x4x256xf32>
    %5 = vector.broadcast %1 : vector<1x4x1xf32> to vector<1x4x256xf32>
    %6 = arith.mulf %4, %5 : vector<1x4x256xf32>
    %7 = vector.broadcast %3 : vector<1x4x1xf32> to vector<1x4x256xf32>
    %8 = arith.addf %6, %7 : vector<1x4x256xf32>
    %c0_6 = arith.constant 0 : index
    %c0_7 = arith.constant 0 : index
    %c0_8 = arith.constant 0 : index
    %9 = vector.load %arg5[%c0_6, %c0_7, %c0_8] : memref<1x4x256xf32, #tpu.memory_space<vmem>>, vector<1x4x256xf32>
    tpu.vector_store %arg5[%c0_6, %c0_7, %c0_8], %8 {strides = array<i32>} : memref<1x4x256xf32, #tpu.memory_space<vmem>>, vector<1x4x256xf32>,
    return
  }
  func.func @transform_0(%arg0: i32, %arg1: i32) -> (i32, i32) {
    %c0_i32 = arith.constant 0 : i32
    %c0_i32_0 = arith.constant 0 : i32
    %c0_i32_1 = arith.constant 0 : i32
    return %c0_i32, %c0_i32_0 : i32, i32
  }
  func.func @transform_1(%arg0: i32, %arg1: i32) -> (i32, i32) {
    %c0_i32 = arith.constant 0 : i32
    %c0_i32_0 = arith.constant 0 : i32
    %c0_i32_1 = arith.constant 0 : i32
    return %c0_i32, %c0_i32_0 : i32, i32
  }
  func.func @transform_2(%arg0: i32, %arg1: i32) -> (i32, i32, i32) {
    %c0_i32 = arith.constant 0 : i32
    %c0_i32_0 = arith.constant 0 : i32
    return %arg0, %c0_i32, %arg1 : i32, i32, i32
  }
  func.func @transform_3(%arg0: i32, %arg1: i32) -> (i32, i32, i32) {
    %c0_i32 = arith.constant 0 : i32
    %c0_i32_0 = arith.constant 0 : i32
    return %arg0, %c0_i32, %arg1 : i32, i32, i32
  }
}

</mosaic_0001>

<bundles_post_ra>
// kernel: tpu_custom_call.1
= control target key start
LH: loop header
LB: loop body
LE: loop exit
PB: predicated region body
PF: predicated region fallthrough
CT: control target
= control target key end

     0   :  { %8 = vsyncpa [#allocation3], 0  ;;  %s617_s0 = inlined_call_operand.vmem [shape: f32[4,1], index: 0, kind: input, shape index: {}]   ;;  %s618_s1 = inlined_call_operand.vmem [shape: f32[4,1], index: 1, kind: input, shape index: {}]   ;;  %s619_s2 = inlined_call_operand.vmem [shape: f32[2,4,256], index: 2, kind: input, shape index: {}]   ;;  %s620_s3 = inlined_call_operand.hbm [shape: f32[2,4,256], index: 3, kind: output, shape index: {}]  }
   0x1   :  { %10 = vsyncpa [#allocation3 + $0x1], 0  ;;  %s499_s12 = smov 0   ;;  %s501_s13 = smov 0  }
   0x2   :  { %s503_s14 = smov 0   ;;  %s505_s15 = smov 0  }
   0x3   :  { %s507_s16 = smov 0   ;;  %s509_s17 = smov 0  }
   0x4 LB: > { %s323_s18 = sadd.s32 4294967295, %s474_s17   ;;  %s324_s19 = sadd.s32 4294967294, %s474_s17   ;;  %s474_s17 = sphi %s509_s17, %s16_s17   ;;  %s470_s16 = sphi %s507_s16, %s627_s16   ;;  %s466_s15 = sphi %s505_s15, %s626_s15   ;;  %s462_s14 = sphi %s503_s14, %s625_s14   ;;  %s458_s13 = sphi %s501_s13, %s624_s13   ;;  %s454_s12 = sphi %s499_s12, %s623_s12  }
   0x5   : > { %s28_s20 = sadd.s32 1, %s470_s16  ;;  %s107_s21 = sadd.s32 1, %s462_s14 }
   0x6   : > { %p30_p0 = scmp.ge.s32.totalorder %s28_s20, 2  ;;  %p117_p1 = scmp.ne.s32.totalorder %s462_s14, %s458_s13 }
   0x7   : > { %p118_p2 = scmp.eq.s32.totalorder %s323_s18, 1  ;;  %p123_p3 = scmp.ne.s32.totalorder %s458_s13, %s454_s12 }
   0x8   : > { %s629_s20 = smov (%p30_p0, %s28_s20), 0  ;;  %p124_p5 = scmp.eq.s32.totalorder %s324_s19, 1 }
   0x9   : > { %p539_p4 = por %p118_p2, %p117_p1  ;;  %s102_s23 = ssub.s32 %s470_s16, %s629_s20 }
   0xa   : > { %p327_p6 = scmp.ge.s32.totalorder %s474_s17, 1  ;;  %p105_p7 = scmp.eq.s32.totalorder %s102_s23, 0 }
   0xb   : > { %p546_p8 = por %p124_p5, %p123_p3  ;;  %p161_p9 = scmp.lt.s32.totalorder %s474_s17, 3 }
   0xc   : > { %s552_s25 = scalar_select %p105_p7, %s462_s14, %s107_s21  }
   0xd   : > { %p162_p10 = pnand %p327_p6, %p161_p9 }
   0xe   : > { %v200_v0 = vld [vmem:[%s617_s0] sm:$0xf] (!%p162_p10)  ;;  %v476_v1 = vmov (!%p162_p10), 0   ;;  %p190_p11 = scmp.lt.s32.totalorder (!%p162_p10), %s466_s15, 1  ;;  %v477_v3 = vmov (!%p162_p10), 839922192   ;;  %v210_v5 = vlaneseq (!%p162_p10) }
   0xf   : > { %165 = sbr.rel (%p162_p10) target bundleno = 166 (0xa6), region = 32  ;;  %395 = vset.pattern.permute.xlu0 (!%p162_p10), %v476_v1  ;;  %v201_v2 = vld [vmem:[%s618_s1] sm:$0xf] (!%p162_p10)  ;;  %v208_v4 = vunpack.c.l.s4 (!%p162_p10), %v477_v3  ;;  %s186_s4 = sand.u32 (!%p162_p10), 1, %s458_s13  }
  0x10   : > { %205 = vperm.xlu0 (!%p162_p10), %395, %v200_v0   ;;  %v211_v7 = vshrl.u32 (!%p162_p10), %v210_v5, 7  ;;  %s328_s6 = sshll.u32 (!%p162_p10), %s186_s4, 3  ;;  %s337_s10 = sshll.u32 (!%p162_p10), %s466_s15, 7 }
  0x11   : > { %v209_v6 = vunpack.c.0.s8 (!%p162_p10), %v208_v4  ;;  %s188_s11 = scalar_lea.vmem (!%p162_p10), [#allocation2], %s328_s6  ;;  %s570_s23 = scalar_lea.hbm (!%p162_p10), %s620_s3, %s337_s10 }
  0x12   : > { %s247_s18 = sshll.u32 (!%p162_p10), %s188_s11, 4  ;;  %s231_s26 = scalar_lea.sflag (!%p162_p10), [#allocation3], %s186_s4  ;;  %s572_s18 = int_to_ptr.vmem [resolvable:$true] %s247_s18 }
  0x13   : > { %v212_v8 = vsub.s32 (!%p162_p10), %v209_v6, %v211_v7  ;;  %s396_s27 = scalar_lea.vmem (!%p162_p10), %s572_s18, 128 }
  0x14   : > { %218 = vperm.xlu0 (!%p162_p10), %395, %v201_v2   ;;  %p397_p12 = scmp.ne.s32.totalorder (!%p162_p10), %s572_s18, %s396_s27 }
  0x16   : > { %s191_s30 = scalar_select %p190_p11, %s466_s15, 1 }
  0x17   : > { %p398_p13 = pnand %p397_p12, %p539_p4  ;;  %s478_s15 = smov [#allocation2]  }
  0x18   : > { %s336_s5 = sshll.u32 %s191_s30, 3  ;;  %s400_s28 = sshll.u32 %s478_s15, 4  ;;  %s401_s28 = int_to_ptr.vmem [resolvable:$false] %s400_s28 }
  0x19   : > { %s197_s9 = scalar_lea.vmem %s619_s2, %s336_s5  ;;  %p399_p0 = pneg %p398_p13 }
  0x1a   : > { %v202_v11 = vld [vmem:[%s197_s9] sm:$0xff]  ;;  %s402_s29 = scalar_lea.vmem %s401_s28, 256  ;;  %p403_p1 = scmp.lt.s32.totalorder %s572_s18, %s401_s28 }
  0x1b   : > { %p404_p2 = scmp.lt.s32.totalorder %s402_s29, %s396_s27 }
  0x1d   : > { %p405_p3 = por %p404_p2, %p403_p1 }
  0x1f   : > { %p406_p5 = pnand %p405_p3, %p399_p0 }
  0x8f   : > { %v206_v9 = vpop.permute.xlu0 %205 }
  0x90   : > { %v213_v10 = vrot.slane %v206_v9, %v212_v8 }
  0x92   : > { %v215_v13 = vmul.f32 %v213_v10, %v202_v11 }
  0x93   : > { %v219_v12 = vpop.permute.xlu0 %218 }
  0x94   : > { %v226_v14 = vrot.slane %v219_v12, %v212_v8 }
  0x96   : > { %v228_v15 = vadd.f32 %v226_v14, %v215_v13 }
  0x98   : > { %229 = vst [vmem:[%s188_s11] sm:$0xff] %v228_v15 }
  0x99   : > { %409 = shalt.err (!%p406_p5)
}
  0x9a   : > { %s410_s30 = scalar_lea.hbm %s570_s23, 128  ;;  %s414_s6 = scalar_lea.hbm %s620_s3, 256 }
  0x9b   : > { %p411_p6 = scmp.ne.s32.totalorder %s570_s23, %s410_s30  ;;  %p415_p10 = scmp.lt.u32.totalorder %s570_s23, %s620_s3 }
  0x9c   : > { %p416_p11 = scmp.lt.u32.totalorder %s414_s6, %s410_s30  ;;  %p418_p13 = scmp.lt.u32.totalorder %s410_s30, %s570_s23 }
  0x9d   : > { %p412_p7 = pnand %p411_p6, %p539_p4 }
  0x9e   : > { %p417_p12 = por %p416_p11, %p415_p10 }
  0x9f   : > { %p413_p9 = pneg %p412_p7 }
  0xa0   : > { %p419_p0 = por %p418_p13, %p417_p12 }
  0xa2   : > { %p420_p1 = pnand %p419_p0, %p413_p9 }
  0xa4   : > { %423 = shalt.err (!%p420_p1)
}
  0xa5   : > { %338 = dma.vmem_to_hbm [thread:$0]  (%p539_p4), %s572_s18, 128, %s570_s23, %s231_s26  }
  0xa6 PF: > { %p344_p2 = scmp.ge.s32.totalorder %s474_s17, 2  ;;  %s259_s9 = sand.u32 1, %s454_s12  }
  0xa7   : > { %s260_s10 = scalar_lea.sflag [#allocation3], %s259_s9 }
  0xa8   : > { %p341_p3 = pnand %p344_p2, %p546_p8 }
  0xaa   : > { %449 = dma.done.wait (!%p341_p3), %s260_s10, 128  }
  0xab   : > { %451 = vsyncadd (!%p341_p3), %s260_s10, 4294967168  ;;  %s16_s17 = sadd.s32 1, %s474_s17   ;;  %s623_s12 = smov %s458_s13 }
  0xac   : > { %p13_p5 = scmp.ge.s32.totalorder %s16_s17, 4   ;;  %s624_s13 = smov %s462_s14 }
  0xad   : > { %s625_s14 = smov %s552_s25  ;;  %s626_s15 = smov %s470_s16 }
  0xae   : > { %s627_s16 = smov %s629_s20  ;;  %15 = sbr.rel (!%p13_p5) target bundleno = 4 (0x4), region = 67 }
  0xb5   :  { %265 = vsyncpa [#allocation3], 1 }
  0xb6   :  { %267 = vsyncpa [#allocation3 + $0x1], 1 }

</bundles_post_ra>
